<compile_context>
chip_gen: v7x
topology: tpu7x:2x2x1
jax: 0.10.0
libtpu: 0.0.40
codegen_flags: <defaults>
</compile_context>

<pallas_src>
import functools

import jax
import jax.numpy as jnp
from jax.experimental import pallas as pl
from jax.experimental.pallas import tpu as pltpu

LANE = 128


def _round_up(x, m):
    return ((x + m - 1) // m) * m


def _cdiv(a, b):
    return -(-a // b)


def _make_mixer_kernel(n_layers):
    """x^T -> ReLU(W0 @ x^T + b0) -> ... -> W_last @ h + b_last (no final ReLU)."""

    def kernel(x_ref, *rest):
        o_ref = rest[-1]
        params = rest[:-1]
        h = x_ref[...]                          # (n_inputs, TB), batch on the lane axis
        for i in range(n_layers):
            w = params[2 * i][...]              # (out_i, in_i) -- PyTorch orientation
            b = params[2 * i + 1][...]          # (out_i, 1)    -- broadcast over lanes
            h = jnp.dot(w, h, preferred_element_type=jnp.float32) + b
            if i < n_layers - 1:                # ReLU on hidden layers only
                h = jnp.maximum(h, 0.0)
        o_ref[...] = h.astype(o_ref.dtype)

    return kernel


def prepare_mixer_params(weights, biases):
    """Flatten params for the kernel.

    weights[i]: (in_i, out_i) f32 (transpose of PyTorch's nn.Linear.weight),
    biases[i]:  (out_i,) f32.
    Returns [W0^T, b0, W1^T, b1, ...] with weights in (out, in) orientation (the native
    PyTorch layout, so torch weights could be passed through untransposed) and biases
    as (out, 1) columns.  No padding is needed in the feature-major formulation.
    """
    params = []
    for w, b in zip(weights, biases):
        params.append(jnp.asarray(w).T)                   # (out, in)
        params.append(jnp.asarray(b).reshape(-1, 1))      # (out, 1)
    return params


def _choose_batch_tile(B, block_b):
    """Pick (tile, padded_B) for the batch (lane) axis."""
    if B < 256:
        return B, B          # single tile; block == full array, so no 128-multiple needed
    # >= 2 tiles so ("parallel",) can actually shard across v7x's two TensorCores, and
    # balanced tile sizes (instead of a fixed block) keep round-up padding small.
    n_tiles = max(2, _cdiv(B, block_b))
    tb = _round_up(_cdiv(B, n_tiles), LANE)   # lane-axis blocks must be multiples of 128
    bp = _round_up(B, tb)
    return tb, bp


@functools.partial(jax.jit, static_argnames=("block_b",))
def true_mixer_forward(q, state, params, *, block_b=2048):
    """Pallas forward pass of TrueMixer.

    q:      (B, dq) float32
    state:  (B, ds) float32
    params: flat list from prepare_mixer_params
    Returns (B, n_outputs) float32.
    """
    assert block_b % LANE == 0, "block_b must be a multiple of 128"
    B = q.shape[0]
    n_in = q.shape[1] + state.shape[1]
    n_layers = len(params) // 2
    n_out = params[-1].shape[0]

    # Fused concat + relayout to feature-major: one cheap pass over 4*n_in bytes/row,
    # paid once so that (a) layer 0 is a single K=n_in matmul and (b) the kernel's
    # output writeback is exactly n_outputs*4 bytes/row (no 128-lane padding).
    x_t = jnp.concatenate([q, state], axis=1).T           # (n_in, B)

    tb, bp = _choose_batch_tile(B, block_b)
    if bp != B:
        x_t = jnp.pad(x_t, ((0, 0), (0, bp - B)))

    kernel = _make_mixer_kernel(n_layers)

    in_specs = [pl.BlockSpec((n_in, tb), lambda i: (0, i))]     # batch-tiled input
    for p in params:
        # Grid-invariant blocks: constant index_map -> DMA'd once, VMEM-resident.
        # TODO(synk): for multi-thousand-wide hiddens, single-buffer these via
        # pipeline_mode to halve resident weight VMEM on v7x's 64 MiB.
        in_specs.append(pl.BlockSpec(p.shape, lambda i: (0, 0)))

    # Advisory cost for XLA's scheduler around the custom call.
    flops = 2 * bp * sum(params[2 * i].shape[0] * params[2 * i].shape[1]
                         for i in range(n_layers))
    bytes_accessed = 4 * (x_t.size + sum(int(p.size) for p in params) + n_out * bp)
    cost = pl.CostEstimate(flops=flops, transcendentals=0,
                           bytes_accessed=bytes_accessed)

    out_t = pl.pallas_call(
        kernel,
        out_shape=jax.ShapeDtypeStruct((n_out, bp), jnp.float32),
        grid=(bp // tb,),
        in_specs=in_specs,
        out_specs=pl.BlockSpec((n_out, tb), lambda i: (0, i)),
        compiler_params=pltpu.CompilerParams(
            dimension_semantics=("parallel",),
            vmem_limit_bytes=32 * 1024 * 1024,
        ),
        cost_estimate=cost,
    )(x_t, *params)

    # Back to batch-major logical shape; padded batch columns are dropped.
    return out_t[:, :B].T


def init_true_mixer_params(key, n_inputs, n_outputs, hidden_conf):
    """PyTorch-Linear-style init: U(-1/sqrt(fan_in), 1/sqrt(fan_in)).

    Weights stored as (in, out) == transpose of PyTorch's (out, in); biases (out,).
    """
    dims = [n_inputs] + list(hidden_conf) + [n_outputs]
    weights, biases = [], []
    for i in range(len(dims) - 1):
        fan_in, fan_out = dims[i], dims[i + 1]
        key, kw, kb = jax.random.split(key, 3)
        bound = 1.0 / (fan_in ** 0.5)
        weights.append(jax.random.uniform(kw, (fan_in, fan_out), jnp.float32, -bound, bound))
        biases.append(jax.random.uniform(kb, (fan_out,), jnp.float32, -bound, bound))
    return weights, biases


def true_mixer_reference(q, state, weights, biases):
    """Pure-JAX reference mirroring the PyTorch forward."""
    x = jnp.concatenate([q, state], axis=1)
    n_layers = len(weights)
    for i in range(n_layers):
        x = x @ weights[i] + biases[i].reshape(1, -1)
        if i < n_layers - 1:
            x = jnp.maximum(x, 0.0)
    return x


if __name__ == "__main__":
    key = jax.random.PRNGKey(0)

    # Module-consistent shapes: n_inputs = dq + ds = 16, two hidden layers, 8 outputs.
    dq, ds = 6, 10
    n_inputs = dq + ds
    hidden_conf = [32, 32]
    n_outputs = 8

    key, kp = jax.random.split(key)
    weights, biases = init_true_mixer_params(kp, n_inputs, n_outputs, hidden_conf)
    params = prepare_mixer_params(weights, biases)

    # B=8 exercises the small single-tile path; B=300 exercises the tiled / "parallel"
    # path (2 tiles of 256 lanes, batch padded to 512).
    for B in (8, 300):
        key, kq, ks = jax.random.split(key, 3)
        q = jax.random.normal(kq, (B, dq), jnp.float32)
        state = jax.random.normal(ks, (B, ds), jnp.float32)

        out = jax.block_until_ready(true_mixer_forward(q, state, params))
        ref = true_mixer_reference(q, state, weights, biases)

        assert out.shape == (B, n_outputs)
        assert jnp.allclose(out, ref, atol=1e-5, rtol=1e-4), f"mismatch vs reference at B={B}"

    print("KERNEL_OK")
</pallas_src>

<mosaic_0001>
module attributes {stable_mosaic.version = 11 : i64} {
  func.func @kernel(%arg0: i32, %arg1: memref<16x8xf32, #tpu.memory_space<vmem>>, %arg2: memref<32x16xf32, #tpu.memory_space<vmem>>, %arg3: memref<32x1xf32, #tpu.memory_space<vmem>>, %arg4: memref<32x32xf32, #tpu.memory_space<vmem>>, %arg5: memref<32x1xf32, #tpu.memory_space<vmem>>, %arg6: memref<8x32xf32, #tpu.memory_space<vmem>>, %arg7: memref<8x1xf32, #tpu.memory_space<vmem>>, %arg8: memref<8x8xf32, #tpu.memory_space<vmem>>) attributes {dimension_semantics = [#tpu.dimension_semantics<parallel>], iteration_bounds = array<i64: 1>, scalar_prefetch = 0 : i64, scratch_operands = 0 : i64, tpu.core_type = #tpu.core_type<tc>, window_params = [{transform_indices = @transform_0, window_bounds = array<i64: 16, 8>}, {pipeline_mode = #tpu.pipeline_mode<synchronous>, transform_indices = @transform_1, window_bounds = array<i64: 32, 16>}, {pipeline_mode = #tpu.pipeline_mode<synchronous>, transform_indices = @transform_2, window_bounds = array<i64: 32, 1>}, {pipeline_mode = #tpu.pipeline_mode<synchronous>, transform_indices = @transform_3, window_bounds = array<i64: 32, 32>}, {pipeline_mode = #tpu.pipeline_mode<synchronous>, transform_indices = @transform_4, window_bounds = array<i64: 32, 1>}, {pipeline_mode = #tpu.pipeline_mode<synchronous>, transform_indices = @transform_5, window_bounds = array<i64: 8, 32>}, {pipeline_mode = #tpu.pipeline_mode<synchronous>, transform_indices = @transform_6, window_bounds = array<i64: 8, 1>}, {transform_indices = @transform_7, window_bounds = array<i64: 8, 8>}]} {
    %c0 = arith.constant 0 : index
    %c0_0 = arith.constant 0 : index
    %0 = vector.load %arg1[%c0, %c0_0] : memref<16x8xf32, #tpu.memory_space<vmem>>, vector<16x8xf32>
    %c0_1 = arith.constant 0 : index
    %c0_2 = arith.constant 0 : index
    %1 = vector.load %arg2[%c0_1, %c0_2] : memref<32x16xf32, #tpu.memory_space<vmem>>, vector<32x16xf32>
    %c0_3 = arith.constant 0 : index
    %c0_4 = arith.constant 0 : index
    %2 = vector.load %arg3[%c0_3, %c0_4] : memref<32x1xf32, #tpu.memory_space<vmem>>, vector<32x1xf32>
    %cst = arith.constant dense<0.000000e+00> : vector<32x8xf32>
    %3 = tpu.matmul %1, %0, %cst {dimension_numbers = #tpu.dot_dimension_numbers<[1], [0], [0], [1], [0, 0, 1, 1], [], []>} : vector<32x16xf32>, vector<16x8xf32>, vector<32x8xf32> -> vector<32x8xf32>
    %4 = vector.broadcast %2 : vector<32x1xf32> to vector<32x8xf32>
    %5 = arith.addf %3, %4 : vector<32x8xf32>
    %cst_5 = arith.constant 0.000000e+00 : f32
    %6 = vector.broadcast %cst_5 : f32 to vector<32x8xf32>
    %7 = arith.maximumf %5, %6 : vector<32x8xf32>
    %c0_6 = arith.constant 0 : index
    %c0_7 = arith.constant 0 : index
    %8 = vector.load %arg4[%c0_6, %c0_7] : memref<32x32xf32, #tpu.memory_space<vmem>>, vector<32x32xf32>
    %c0_8 = arith.constant 0 : index
    %c0_9 = arith.constant 0 : index
    %9 = vector.load %arg5[%c0_8, %c0_9] : memref<32x1xf32, #tpu.memory_space<vmem>>, vector<32x1xf32>
    %cst_10 = arith.constant dense<0.000000e+00> : vector<32x8xf32>
    %10 = tpu.matmul %8, %7, %cst_10 {dimension_numbers = #tpu.dot_dimension_numbers<[1], [0], [0], [1], [0, 0, 1, 1], [], []>} : vector<32x32xf32>, vector<32x8xf32>, vector<32x8xf32> -> vector<32x8xf32>
    %11 = vector.broadcast %9 : vector<32x1xf32> to vector<32x8xf32>
    %12 = arith.addf %10, %11 : vector<32x8xf32>
    %cst_11 = arith.constant 0.000000e+00 : f32
    %13 = vector.broadcast %cst_11 : f32 to vector<32x8xf32>
    %14 = arith.maximumf %12, %13 : vector<32x8xf32>
    %c0_12 = arith.constant 0 : index
    %c0_13 = arith.constant 0 : index
    %15 = vector.load %arg6[%c0_12, %c0_13] : memref<8x32xf32, #tpu.memory_space<vmem>>, vector<8x32xf32>
    %c0_14 = arith.constant 0 : index
    %c0_15 = arith.constant 0 : index
    %16 = vector.load %arg7[%c0_14, %c0_15] : memref<8x1xf32, #tpu.memory_space<vmem>>, vector<8x1xf32>
    %cst_16 = arith.constant dense<0.000000e+00> : vector<8x8xf32>
    %17 = tpu.matmul %15, %14, %cst_16 {dimension_numbers = #tpu.dot_dimension_numbers<[1], [0], [0], [1], [0, 0, 1, 1], [], []>} : vector<8x32xf32>, vector<32x8xf32>, vector<8x8xf32> -> vector<8x8xf32>
    %18 = vector.broadcast %16 : vector<8x1xf32> to vector<8x8xf32>
    %19 = arith.addf %17, %18 : vector<8x8xf32>
    %c0_17 = arith.constant 0 : index
    %c0_18 = arith.constant 0 : index
    %20 = vector.load %arg8[%c0_17, %c0_18] : memref<8x8xf32, #tpu.memory_space<vmem>>, vector<8x8xf32>
    tpu.vector_store %arg8[%c0_17, %c0_18], %19 {strides = array<i32>} : memref<8x8xf32, #tpu.memory_space<vmem>>, vector<8x8xf32>,
    return
  }
  func.func @transform_0(%arg0: i32) -> (i32, i32) {
    %c0_i32 = arith.constant 0 : i32
    %c0_i32_0 = arith.constant 0 : i32
    return %c0_i32, %arg0 : i32, i32
  }
  func.func @transform_1(%arg0: i32) -> (i32, i32) {
    %c0_i32 = arith.constant 0 : i32
    %c0_i32_0 = arith.constant 0 : i32
    %c0_i32_1 = arith.constant 0 : i32
    return %c0_i32, %c0_i32_0 : i32, i32
  }
  func.func @transform_2(%arg0: i32) -> (i32, i32) {
    %c0_i32 = arith.constant 0 : i32
    %c0_i32_0 = arith.constant 0 : i32
    %c0_i32_1 = arith.constant 0 : i32
    return %c0_i32, %c0_i32_0 : i32, i32
  }
  func.func @transform_3(%arg0: i32) -> (i32, i32) {
    %c0_i32 = arith.constant 0 : i32
    %c0_i32_0 = arith.constant 0 : i32
    %c0_i32_1 = arith.constant 0 : i32
    return %c0_i32, %c0_i32_0 : i32, i32
  }
  func.func @transform_4(%arg0: i32) -> (i32, i32) {
    %c0_i32 = arith.constant 0 : i32
    %c0_i32_0 = arith.constant 0 : i32
    %c0_i32_1 = arith.constant 0 : i32
    return %c0_i32, %c0_i32_0 : i32, i32
  }
  func.func @transform_5(%arg0: i32) -> (i32, i32) {
    %c0_i32 = arith.constant 0 : i32
    %c0_i32_0 = arith.constant 0 : i32
    %c0_i32_1 = arith.constant 0 : i32
    return %c0_i32, %c0_i32_0 : i32, i32
  }
  func.func @transform_6(%arg0: i32) -> (i32, i32) {
    %c0_i32 = arith.constant 0 : i32
    %c0_i32_0 = arith.constant 0 : i32
    %c0_i32_1 = arith.constant 0 : i32
    return %c0_i32, %c0_i32_0 : i32, i32
  }
  func.func @transform_7(%arg0: i32) -> (i32, i32) {
    %c0_i32 = arith.constant 0 : i32
    %c0_i32_0 = arith.constant 0 : i32
    return %c0_i32, %arg0 : i32, i32
  }
}

</mosaic_0001>

<bundles_post_ra>
// kernel: true_mixer_forward.1
= control target key start
LH: loop header
LB: loop body
LE: loop exit
PB: predicated region body
PF: predicated region fallthrough
CT: control target
= control target key end

     0   :  { %vm56_vm0 = vcmask 130048   ;;  %v461_v3 = vmov 0   ;;  %vm186_vm1 = vcmask 261120   ;;  %v462_v39 = vmov 0.0|0.0   ;;  %s577_s0 = inlined_call_operand.vmem [shape: f32[16,8], index: 0, kind: input, shape index: {}]   ;;  %s578_s1 = inlined_call_operand.vmem [shape: f32[32,16], index: 1, kind: input, shape index: {}]   ;;  %s579_s2 = inlined_call_operand.vmem [shape: f32[32,1], index: 2, kind: input, shape index: {}]   ;;  %s580_s4 = inlined_call_operand.vmem [shape: f32[32,1], index: 4, kind: input, shape index: {}]   ;;  %s581_s6 = inlined_call_operand.vmem [shape: f32[8,1], index: 6, kind: input, shape index: {}]   ;;  %s582_s3 = inlined_call_operand.vmem [shape: f32[32,32], index: 3, kind: input, shape index: {}]   ;;  %s583_s5 = inlined_call_operand.vmem [shape: f32[8,32], index: 5, kind: input, shape index: {}]   ;;  %s584_s7 = inlined_call_operand.vmem [shape: f32[8,8], index: 7, kind: output, shape index: {}]  }
   0x1   :  { %v26_v0 = vld [vmem:[%s577_s0] sm:$0xff]  ;;  %v27_v1 = vld [vmem:[%s577_s0 + $0x8] sm:$0xff]  ;;  %459 = vset.pattern.permute.xlu0 %v461_v3  ;;  %460 = vset.pattern.permute.xlu1 %v461_v3  ;;  %v34_v6 = vld [vmem:[%s579_s2 + $0x10] sm:$0xff]  ;;  %vm463_vm2 = vmmov 0   ;;  %v464_v40 = vmov 0.0   ;;  %vm368_vm3 = vcmask 64512  }
   0x2   :  { %v28_v2 = vld [vmem:[%s578_s1] sm:$0xff]  ;;  %v437_v4 = vpack.c.bf16 %v27_v1, %v26_v0  ;;  %v29_v7 = vld [vmem:[%s578_s1 + $0x8] sm:$0xff]  ;;  %48 = vperm.xlu1 %460, %v34_v6   ;;  %v30_v9 = vld [vmem:[%s578_s1 + $0x10] sm:$0xff] }
   0x3   :  { %406 = vmatprep.mubr.msk.f32.mxu0 %vm56_vm0, %v28_v2  ;;  %v32_v5 = vld [vmem:[%s579_s2] sm:$0xff]  ;;  %v33_v8 = vld [vmem:[%s579_s2 + $0x8] sm:$0xff]  ;;  %v35_v10 = vld [vmem:[%s579_s2 + $0x18] sm:$0xff] }
   0x4   :  { %438 = vmatprep.subr.bf16.mxu0 %v437_v4  ;;  %38 = vperm.xlu0 %459, %v32_v5   ;;  %v31_v11 = vld [vmem:[%s578_s1 + $0x18] sm:$0xff]  ;;  %v162_v12 = vld [vmem:[%s580_s4] sm:$0xff]  ;;  %v163_v13 = vld [vmem:[%s580_s4 + $0x8] sm:$0xff] }
   0x5   :  { %440 = vmatpush3.bf16.msra.mxu0 %v437_v4  ;;  %v164_v14 = vld [vmem:[%s580_s4 + $0x10] sm:$0xff]  ;;  %v165_v15 = vld [vmem:[%s580_s4 + $0x18] sm:$0xff]  ;;  %v289_v16 = vld [vmem:[%s581_s6] sm:$0xff] }
   0x6   :  { %53 = vperm.xlu1 %460, %v35_v10   ;;  %v158_v17 = vld [vmem:[%s582_s3] sm:$0xff]  ;;  %v159_v36 = vld [vmem:[%s582_s3 + $0x8] sm:$0xff]  ;;  %v160_v37 = vld [vmem:[%s582_s3 + $0x10] sm:$0xff]  ;;  %449 = vmatprep.subr.bf16.mxu0 %v462_v39 }
   0x7   :  { %420 = vmatprep.mubr.msk.f32.mxu1 %vm186_vm1, %v158_v17  ;;  %v161_v38 = vld [vmem:[%s582_s3 + $0x18] sm:$0xff]  ;;  %v288_v59 = vld [vmem:[%s583_s5] sm:$0xff] }
   0x8   :  { %407 = vmatmul.mubr.msk.f32.vlgmr.msra.gmra.mrb[0].mxu0 %vm56_vm0, %v29_v7  ;;  %43 = vperm.xlu0 %459, %v33_v8  }
   0x9   :  { %409 = vmatprep.mubr.msk.f32.mxu0 %vm56_vm0, %v30_v9 }
   0xa   :  { %173 = vperm.xlu1 %460, %v163_v13  }
   0xc   :  { %410 = vmatmul.mubr.msk.f32.gmra.mrb[2].mxu0 %vm56_vm0, %v31_v11  ;;  %168 = vperm.xlu0 %459, %v162_v12  }
   0xd   :  { %434 = vmatprep.mubr.msk.f32.mxu0 %vm463_vm2, %v464_v40 }
   0xe   :  { %183 = vperm.xlu1 %460, %v165_v15  }
  0x10   :  { %178 = vperm.xlu0 %459, %v164_v14  }
  0x14   :  { %292 = vperm.xlu0 %459, %v289_v16  }
  0x81   :  { %v49_v19 = vpop.permute.xlu1 %48 }
  0x83   :  { %v39_v18 = vpop.permute.xlu0 %38 }
  0x85   :  { %v54_v26 = vpop.permute.xlu1 %53 }
  0x87   :  { %v44_v20 = vpop.permute.xlu0 %43 }
  0x89   :  { %v174_v41 = vpop.permute.xlu1 %173 }
  0x8b   :  { %v169_v42 = vpop.permute.xlu0 %168 }
  0x8d   :  { %v184_v48 = vpop.permute.xlu1 %183 }
  0x8f   :  { %v179_v51 = vpop.permute.xlu0 %178 }
  0x93   :  { %v293_v60 = vpop.permute.xlu0 %292 }
  0xdb   :  { %v408_v21 = vpop.f32.mrb[0].mxu0 }
  0xdc   :  { %v141_v22 = vadd.f32 %v408_v21, %v44_v20  ;;  %v135_v23 = vpop.f32.mrb[1].mxu0 }
  0xdd   :  { %v136_v24 = vadd.f32 %v135_v23, %v39_v18 }
  0xde   :  { %v155_v25 = vmax.f32 %v141_v22, 0.0 }
  0xdf   :  { %v154_v27 = vmax.f32 %v136_v24, 0.0  ;;  %v411_v28 = vpop.f32.mrb[2].mxu0 }
  0xe0   :  { %v151_v29 = vadd.f32 %v411_v28, %v54_v26  ;;  %v145_v30 = vpop.f32.mrb[3].mxu0 }
  0xe1   :  { %v146_v31 = vadd.f32 %v145_v30, %v49_v19  ;;  %v441_v32 = vpack.c.bf16 %v155_v25, %v154_v27 }
  0xe2   :  { %v157_v33 = vmax.f32 %v151_v29, 0.0 }
  0xe3   :  { %v156_v34 = vmax.f32 %v146_v31, 0.0  ;;  %442 = vmatprep.subr.bf16.mxu1 %v441_v32 }
  0xe4   :  { %444 = vmatpush3.bf16.msra.mxu1 %v441_v32 }
  0xe5   :  { %v445_v35 = vpack.c.bf16 %v157_v33, %v156_v34 }
  0xe7   :  { %446 = vmatprep.subr.bf16.mxu1 %v445_v35 }
  0xe8   :  { %448 = vmatpush3.bf16.msra.mxu1 %v445_v35 }
  0xeb   :  { %421 = vmatmul.mubr.msk.f32.vlgmr.msra.gmra.mrb[0].mxu1 %vm186_vm1, %v159_v36 }
  0xec   :  { %423 = vmatprep.mubr.msk.f32.mxu1 %vm186_vm1, %v160_v37 }
  0xef   :  { %424 = vmatmul.mubr.msk.f32.gmra.mrb[2].mxu1 %vm186_vm1, %v161_v38 }
 0x1be   :  { %v422_v43 = vpop.f32.mrb[0].mxu1 }
 0x1bf   :  { %v271_v44 = vadd.f32 %v422_v43, %v174_v41  ;;  %v265_v45 = vpop.f32.mrb[1].mxu1 }
 0x1c0   :  { %v266_v46 = vadd.f32 %v265_v45, %v169_v42 }
 0x1c1   :  { %v285_v47 = vmax.f32 %v271_v44, 0.0 }
 0x1c2   :  { %v284_v49 = vmax.f32 %v266_v46, 0.0  ;;  %v425_v50 = vpop.f32.mrb[2].mxu1 }
 0x1c3   :  { %v281_v52 = vadd.f32 %v425_v50, %v184_v48  ;;  %v275_v53 = vpop.f32.mrb[3].mxu1 }
 0x1c4   :  { %v450_v54 = vpack.c.bf16 %v285_v47, %v284_v49  ;;  %v276_v55 = vadd.f32 %v275_v53, %v179_v51 }
 0x1c5   :  { %v287_v56 = vmax.f32 %v281_v52, 0.0 }
 0x1c6   :  { %v286_v57 = vmax.f32 %v276_v55, 0.0  ;;  %451 = vmatpush3.bf16.msra.mxu0 %v450_v54 }
 0x1c7   :  { %452 = vmatprep.subr.bf16.mxu0 %v462_v39 }
 0x1c8   :  { %v453_v58 = vpack.c.bf16 %v287_v56, %v286_v57 }
 0x1ca   :  { %454 = vmatpush3.bf16.msra.mxu0 %v453_v58 }
 0x1cd   :  { %435 = vmatmul.mubr.msk.f32.vlgmr.msra.gmra.mrb[4].mxu0 %vm186_vm1, %v288_v59 }
 0x2a0   :  { %v364_v61 = vpop.f32.mrb[4].mxu0 }
 0x2a1   :  { %v365_v62 = vadd.f32 %v364_v61, %v293_v60  ;;  %v436_v63 = vpop.f32.mrb[5].mxu0 }
 0x2a3   :  { %369 = vst.msk [vmem:[%s584_s7] sm:$0xff] %vm368_vm3, %v365_v62 }

</bundles_post_ra>
